<compile_context>
chip_gen: v7x
topology: tpu7x:2x2x1
jax: 0.10.0
libtpu: 0.0.40
codegen_flags: <defaults>
</compile_context>

<pallas_src>
import jax
import jax.numpy as jnp
from jax.experimental import pallas as pl
from jax.experimental.pallas import tpu as pltpu

DROPOUT_P = 0.5  # matches Model(dropout_p=0.5); F.dropout default training=True


def sdpa_dropout_kernel(q_ref, k_ref, v_ref, wq_ref, wk_ref, wv_ref, bits_ref,
                        o_ref):
    """Fused: 3x Linear(bias=False) -> q @ k^T -> scale -> dropout -> @ v_proj."""
    # torch.nn.Linear: y = x @ W.T with W = (out, in).  Contract the last dim of
    # x with the last dim of W -> same result, no in-kernel transpose.
    contract_last = (((1,), (1,)), ((), ()))
    q = jax.lax.dot_general(q_ref[...], wq_ref[...], contract_last,
                            preferred_element_type=jnp.float32)
    k = jax.lax.dot_general(k_ref[...], wk_ref[...], contract_last,
                            preferred_element_type=jnp.float32)
    kv = jax.lax.dot_general(v_ref[...], wv_ref[...], contract_last,
                             preferred_element_type=jnp.float32)

    # qkt = q @ k.permute(1, 0) -> (Lq, Lk); contract emb dim of both (no .T).
    qkt = jax.lax.dot_general(q, k, contract_last,
                              preferred_element_type=jnp.float32)

    # scale = qkt.size(-1) ** -0.5 (static), folded together with the dropout
    # rescale 1 / (1 - p) into a single constant.
    combined_scale = (float(qkt.shape[-1]) ** -0.5) / (1.0 - DROPOUT_P)

    # F.dropout(p, training=True): Bernoulli keep mask with prob (1 - p).
    # Decision taken on raw uint32 bits: keep iff bits >= p * 2^32.
    keep_threshold = jnp.uint32(int(DROPOUT_P * (1 << 32)))
    keep = bits_ref[...] >= keep_threshold
    dropped = jnp.where(keep, qkt * combined_scale, 0.0)

    # result = dropout(qkt_scaled) @ value_proj -> (Lq, E)
    o_ref[...] = jnp.dot(dropped, kv, preferred_element_type=jnp.float32)


def model_forward(query, key, value, wq, wk, wv, rng_key):
    Lq, E = query.shape
    Lk = key.shape[0]
    # TODO(synk): dropout bits come from JAX's stateless RNG (host-side), not
    # PyTorch's RNG stream; mask values differ but the Bernoulli(1-p) +
    # 1/(1-p) rescale semantics match exactly.
    bits = jax.random.bits(rng_key, (Lq, Lk), dtype=jnp.uint32)

    vmem = pl.BlockSpec(memory_space=pltpu.MemorySpace.VMEM)
    return pl.pallas_call(
        sdpa_dropout_kernel,
        out_shape=jax.ShapeDtypeStruct((Lq, E), jnp.float32),
        in_specs=[vmem] * 7,
        out_specs=vmem,
    )(query, key, value, wq, wk, wv, bits)


if __name__ == "__main__":
    emb_dim = 128   # lane-dense E (full 128-lane vregs, full MXU contraction)
    Lq, Lk = 16, 8

    root = jax.random.PRNGKey(0)
    kq, kk, kv_, kwq, kwk, kwv, kdrop = jax.random.split(root, 7)

    query = jax.random.normal(kq, (Lq, emb_dim), dtype=jnp.float32)
    key = jax.random.normal(kk, (Lk, emb_dim), dtype=jnp.float32)
    value = jax.random.normal(kv_, (Lk, emb_dim), dtype=jnp.float32)

    # Deterministic Linear weight init (torch default: U(-1/sqrt(in), 1/sqrt(in)))
    bound = 1.0 / (emb_dim ** 0.5)
    wq = jax.random.uniform(kwq, (emb_dim, emb_dim), jnp.float32, -bound, bound)
    wk = jax.random.uniform(kwk, (emb_dim, emb_dim), jnp.float32, -bound, bound)
    wv = jax.random.uniform(kwv, (emb_dim, emb_dim), jnp.float32, -bound, bound)

    out = model_forward(query, key, value, wq, wk, wv, kdrop)
    jax.block_until_ready(out)
    assert out.shape == (Lq, emb_dim), out.shape
    print("KERNEL_OK")
</pallas_src>

<mosaic_0001>
module attributes {stable_mosaic.version = 11 : i64} {
  func.func @sdpa_dropout_kernel(%arg0: memref<16x128xf32, #tpu.memory_space<vmem>>, %arg1: memref<8x128xf32, #tpu.memory_space<vmem>>, %arg2: memref<8x128xf32, #tpu.memory_space<vmem>>, %arg3: memref<128x128xf32, #tpu.memory_space<vmem>>, %arg4: memref<128x128xf32, #tpu.memory_space<vmem>>, %arg5: memref<128x128xf32, #tpu.memory_space<vmem>>, %arg6: memref<16x8xi32, #tpu.memory_space<vmem>>, %arg7: memref<16x128xf32, #tpu.memory_space<vmem>>) attributes {dimension_semantics = [], scalar_prefetch = 0 : i64, scratch_operands = 0 : i64, tpu.core_type = #tpu.core_type<tc>} {
    %c0 = arith.constant 0 : index
    %c0_0 = arith.constant 0 : index
    %0 = vector.load %arg0[%c0, %c0_0] : memref<16x128xf32, #tpu.memory_space<vmem>>, vector<16x128xf32>
    %c0_1 = arith.constant 0 : index
    %c0_2 = arith.constant 0 : index
    %1 = vector.load %arg3[%c0_1, %c0_2] : memref<128x128xf32, #tpu.memory_space<vmem>>, vector<128x128xf32>
    %cst = arith.constant dense<0.000000e+00> : vector<16x128xf32>
    %2 = tpu.matmul %0, %1, %cst {dimension_numbers = #tpu.dot_dimension_numbers<[1], [1], [0], [0], [0, 0, 1, 0], [], []>} : vector<16x128xf32>, vector<128x128xf32>, vector<16x128xf32> -> vector<16x128xf32>
    %c0_3 = arith.constant 0 : index
    %c0_4 = arith.constant 0 : index
    %3 = vector.load %arg1[%c0_3, %c0_4] : memref<8x128xf32, #tpu.memory_space<vmem>>, vector<8x128xf32>
    %c0_5 = arith.constant 0 : index
    %c0_6 = arith.constant 0 : index
    %4 = vector.load %arg4[%c0_5, %c0_6] : memref<128x128xf32, #tpu.memory_space<vmem>>, vector<128x128xf32>
    %cst_7 = arith.constant dense<0.000000e+00> : vector<8x128xf32>
    %5 = tpu.matmul %3, %4, %cst_7 {dimension_numbers = #tpu.dot_dimension_numbers<[1], [1], [0], [0], [0, 0, 1, 0], [], []>} : vector<8x128xf32>, vector<128x128xf32>, vector<8x128xf32> -> vector<8x128xf32>
    %c0_8 = arith.constant 0 : index
    %c0_9 = arith.constant 0 : index
    %6 = vector.load %arg2[%c0_8, %c0_9] : memref<8x128xf32, #tpu.memory_space<vmem>>, vector<8x128xf32>
    %c0_10 = arith.constant 0 : index
    %c0_11 = arith.constant 0 : index
    %7 = vector.load %arg5[%c0_10, %c0_11] : memref<128x128xf32, #tpu.memory_space<vmem>>, vector<128x128xf32>
    %cst_12 = arith.constant dense<0.000000e+00> : vector<8x128xf32>
    %8 = tpu.matmul %6, %7, %cst_12 {dimension_numbers = #tpu.dot_dimension_numbers<[1], [1], [0], [0], [0, 0, 1, 0], [], []>} : vector<8x128xf32>, vector<128x128xf32>, vector<8x128xf32> -> vector<8x128xf32>
    %cst_13 = arith.constant dense<0.000000e+00> : vector<16x8xf32>
    %9 = tpu.matmul %2, %5, %cst_13 {dimension_numbers = #tpu.dot_dimension_numbers<[1], [1], [0], [0], [0, 0, 1, 0], [], []>} : vector<16x128xf32>, vector<8x128xf32>, vector<16x8xf32> -> vector<16x8xf32>
    %c0_14 = arith.constant 0 : index
    %c0_15 = arith.constant 0 : index
    %10 = vector.load %arg6[%c0_14, %c0_15] : memref<16x8xi32, #tpu.memory_space<vmem>>, vector<16x8xi32>
    %c-2147483648_i32 = arith.constant -2147483648 : i32
    %11 = vector.broadcast %c-2147483648_i32 : i32 to vector<16x8xi32>
    %12 = arith.cmpi uge, %10, %11 : vector<16x8xi32>
    %cst_16 = arith.constant 0.707106769 : f32
    %13 = vector.broadcast %cst_16 : f32 to vector<16x8xf32>
    %14 = arith.mulf %9, %13 : vector<16x8xf32>
    %cst_17 = arith.constant 0.000000e+00 : f32
    %15 = vector.broadcast %cst_17 : f32 to vector<16x8xf32>
    %16 = arith.select %12, %14, %15 : vector<16x8xi1>, vector<16x8xf32>
    %cst_18 = arith.constant dense<0.000000e+00> : vector<16x128xf32>
    %17 = tpu.matmul %16, %8, %cst_18 {dimension_numbers = #tpu.dot_dimension_numbers<[1], [0], [0], [1], [0, 0, 1, 1], [], []>} : vector<16x8xf32>, vector<8x128xf32>, vector<16x128xf32> -> vector<16x128xf32>
    %c0_19 = arith.constant 0 : index
    %c0_20 = arith.constant 0 : index
    %18 = vector.load %arg7[%c0_19, %c0_20] : memref<16x128xf32, #tpu.memory_space<vmem>>, vector<16x128xf32>
    tpu.vector_store %arg7[%c0_19, %c0_20], %17 {strides = array<i32>} : memref<16x128xf32, #tpu.memory_space<vmem>>, vector<16x128xf32>,
    return
  }
}

</mosaic_0001>

<bundles_post_ra>
// kernel: tpu_custom_call.1
= control target key start
LH: loop header
LB: loop body
LE: loop exit
PB: predicated region body
PF: predicated region fallthrough
CT: control target
= control target key end

     0   :  { %12 = vsyncpa [#allocation3], 0  ;;  %s1073_s0 = inlined_call_operand.vmem [shape: f32[16,128], index: 0, kind: input, shape index: {}]   ;;  %s1074_s1 = inlined_call_operand.vmem [shape: f32[8,128], index: 1, kind: input, shape index: {}]   ;;  %s1075_s2 = inlined_call_operand.hbm [shape: f32[8,128], index: 2, kind: input, shape index: {}]   ;;  %s1076_s3 = inlined_call_operand.hbm [shape: f32[128,128], index: 3, kind: input, shape index: {}]   ;;  %s1077_s4 = inlined_call_operand.hbm [shape: f32[128,128], index: 4, kind: input, shape index: {}]   ;;  %s1078_s5 = inlined_call_operand.hbm [shape: f32[128,128], index: 5, kind: input, shape index: {}]   ;;  %s1079_s6 = inlined_call_operand.vmem [shape: u32[16,8], index: 6, kind: input, shape index: {}]   ;;  %s1080_s7 = inlined_call_operand.hbm [shape: f32[16,128], index: 7, kind: output, shape index: {}]  }
   0x1   :  { %13 = vsyncpa [#allocation6], 0 }
   0x2   :  { %14 = vsyncpa [#allocation9], 0 }
   0x3   :  { %15 = vsyncpa [#allocation4], 0  ;;  %s916_s24 = smov [#allocation5]   ;;  %s798_s28 = scalar_lea.hbm %s1076_s3, 2048 }
   0x4   :  { %s35_s25 = sshll.u32 %s916_s24, 4  ;;  %p799_p0 = scmp.ne.s32.totalorder %s1076_s3, %s798_s28  ;;  %s36_s25 = int_to_ptr.vmem [resolvable:$true] %s35_s25 }
   0x5   :  { %p802_p1 = scmp.lt.u32.totalorder %s798_s28, %s1076_s3 }
   0x7   :  { %p804_p2 = pnand %p802_p1, %p799_p0 }
   0x9   :  { %807 = shalt.err (!%p804_p2)
}
   0xa   :  { %s808_s10 = scalar_lea.vmem %s36_s25, 2048  ;;  %p813_p4 = scmp.lt.s32.totalorder %s36_s25, %s36_s25 }
   0xb   :  { %p809_p3 = scmp.ne.s32.totalorder %s36_s25, %s808_s10  ;;  %p814_p5 = scmp.lt.s32.totalorder %s808_s10, %s808_s10 }
   0xd   :  { %p815_p6 = por %p814_p5, %p813_p4 }
   0xf   :  { %p816_p7 = pnand %p815_p6, %p809_p3 }
  0x11   :  { %819 = shalt.err (!%p816_p7)
}
  0x12   :  { %s917_s11 = smov 128   ;;  %s918_s12 = smov 8  }
  0x13   :  { %41 = dma.hbm_to_vmem [thread:$0]  %s1076_s3, 2048, %s36_s25, [#allocation6], %s917_s11, %s917_s11, %s918_s12  }
  0x14   :  { %s919_s15 = smov [#allocation2]   ;;  %s920_s17 = smov [#allocation7]  }
  0x15   :  { %s26_s16 = sshll.u32 %s919_s15, 4  ;;  %s47_s18 = sshll.u32 %s920_s17, 4  ;;  %s27_s16 = int_to_ptr.vmem [resolvable:$true] %s26_s16  ;;  %s48_s18 = int_to_ptr.vmem [resolvable:$true] %s47_s18 }
  0x16   :  { %s820_s21 = scalar_lea.hbm %s1075_s2, 128 }
  0x17   :  { %p821_p8 = scmp.ne.s32.totalorder %s1075_s2, %s820_s21  ;;  %p824_p9 = scmp.lt.u32.totalorder %s820_s21, %s1075_s2 }
  0x19   :  { %p826_p10 = pnand %p824_p9, %p821_p8 }
  0x1b   :  { %829 = shalt.err (!%p826_p10)
}
  0x1c   :  { %s830_s3 = scalar_lea.vmem %s27_s16, 128  ;;  %p835_p12 = scmp.lt.s32.totalorder %s27_s16, %s27_s16 }
  0x1d   :  { %p831_p11 = scmp.ne.s32.totalorder %s27_s16, %s830_s3  ;;  %p836_p13 = scmp.lt.s32.totalorder %s830_s3, %s830_s3 }
  0x1f   :  { %p837_p0 = por %p836_p13, %p835_p12 }
  0x21   :  { %p838_p1 = pnand %p837_p0, %p831_p11 }
  0x23   :  { %841 = shalt.err (!%p838_p1)
}
  0x24   :  { %29 = dma.hbm_to_vmem [thread:$0]  %s1075_s2, 128, %s27_s16, [#allocation3]  }
  0x25   :  { %s842_s30 = scalar_lea.hbm %s1077_s4, 2048 }
  0x26   :  { %p843_p2 = scmp.ne.s32.totalorder %s1077_s4, %s842_s30  ;;  %p846_p3 = scmp.lt.u32.totalorder %s842_s30, %s1077_s4 }
  0x28   :  { %p848_p4 = pnand %p846_p3, %p843_p2 }
  0x2a   :  { %851 = shalt.err (!%p848_p4)
}
  0x2b   :  { %s852_s14 = scalar_lea.vmem %s48_s18, 2048  ;;  %p857_p6 = scmp.lt.s32.totalorder %s48_s18, %s48_s18 }
  0x2c   :  { %p853_p5 = scmp.ne.s32.totalorder %s48_s18, %s852_s14  ;;  %p858_p7 = scmp.lt.s32.totalorder %s852_s14, %s852_s14 }
  0x2e   :  { %p859_p8 = por %p858_p7, %p857_p6 }
  0x30   :  { %p860_p9 = pnand %p859_p8, %p853_p5 }
  0x32   :  { %863 = shalt.err (!%p860_p9)
}
  0x33   :  { %53 = dma.hbm_to_vmem [thread:$0]  %s1077_s4, 2048, %s48_s18, [#allocation6], %s917_s11, %s917_s11, %s918_s12  }
  0x34   :  { %s921_s16 = smov [#allocation8]   ;;  %s864_s21 = scalar_lea.hbm %s1078_s5, 2048 }
  0x35   :  { %s59_s17 = sshll.u32 %s921_s16, 4  ;;  %p865_p10 = scmp.ne.s32.totalorder %s1078_s5, %s864_s21  ;;  %s60_s17 = int_to_ptr.vmem [resolvable:$true] %s59_s17 }
  0x36   :  { %p868_p11 = scmp.lt.u32.totalorder %s864_s21, %s1078_s5 }
  0x38   :  { %p870_p12 = pnand %p868_p11, %p865_p10 }
  0x3a   :  { %873 = shalt.err (!%p870_p12)
}
  0x3b   :  { %s874_s3 = scalar_lea.vmem %s60_s17, 2048  ;;  %p879_p0 = scmp.lt.s32.totalorder %s60_s17, %s60_s17 }
  0x3c   :  { %p875_p13 = scmp.ne.s32.totalorder %s60_s17, %s874_s3  ;;  %p880_p1 = scmp.lt.s32.totalorder %s874_s3, %s874_s3 }
  0x3e   :  { %p881_p2 = por %p880_p1, %p879_p0 }
  0x40   :  { %p882_p3 = pnand %p881_p2, %p875_p13 }
  0x42   :  { %885 = shalt.err (!%p882_p3)
}
  0x43   :  { %65 = dma.hbm_to_vmem [thread:$0]  %s1078_s5, 2048, %s60_s17, [#allocation9], %s917_s11, %s917_s11, %s918_s12  }
  0x44   :  { %908 = dma.done.wait [#allocation3], 128  }
  0x45   :  { %909 = vsyncadd [#allocation3], 4294967168 }
  0x46   :  { %910 = dma.done.wait [#allocation6], 4096  }
  0x47   :  { %911 = vsyncadd [#allocation6], 4294963200 }
  0x48   :  { %912 = dma.done.wait [#allocation9], 2048  }
  0x49   :  { %913 = vsyncadd [#allocation9], 4294965248  ;;  %v922_v0 = vmov 0.0|0.0   ;;  %vm923_vm0 = vmmov 0   ;;  %v924_v1 = vmov 0.0   ;;  %v174_v2 = vld [vmem:[#allocation7] sm:$0xff] }
  0x4a   :  { %740 = vmatprep.subr.bf16.mxu1 %v922_v0  ;;  %660 = vmatprep.mubr.msk.f32.mxu1 %vm923_vm0, %v924_v1  ;;  %v175_v3 = vld [vmem:[#allocation7 + $0x8] sm:$0xff]  ;;  %v82_v4 = vld [vmem:[#allocation5] sm:$0xff]  ;;  %v84_v8 = vld [vmem:[#allocation5 + $0x10] sm:$0xff]  ;;  %vm430_vm3 = vcmask 64512   ;;  %s925_s10 = smov [#allocation10]  }
  0x4b   :  { %v741_v5 = vpack.c.bf16 %v175_v3, %v174_v2  ;;  %v83_v6 = vld [vmem:[#allocation5 + $0x8] sm:$0xff]  ;;  %v85_v9 = vld [vmem:[#allocation5 + $0x18] sm:$0xff]  ;;  %v176_v11 = vld [vmem:[#allocation7 + $0x10] sm:$0xff]  ;;  %s519_s13 = sshll.u32 %s925_s10, 4  ;;  %s520_s13 = int_to_ptr.vmem [resolvable:$true] %s519_s13 }
  0x4c   :  { %v708_v7 = vpack.c.bf16 %v83_v6, %v82_v4  ;;  %v712_v10 = vpack.c.bf16 %v85_v9, %v84_v8  ;;  %v177_v12 = vld [vmem:[#allocation7 + $0x18] sm:$0xff]  ;;  %v86_v14 = vld [vmem:[#allocation5 + $0x20] sm:$0xff]  ;;  %v87_v15 = vld [vmem:[#allocation5 + $0x28] sm:$0xff]  ;;  %s886_s14 = scalar_lea.vmem %s520_s13, 256  ;;  %p891_p5 = scmp.lt.s32.totalorder %s520_s13, %s520_s13 }
  0x4d   :  { %742 = vmatpush3.bf16.xpose.msra.mxu1 %v741_v5  ;;  %v744_v13 = vpack.c.bf16 %v177_v12, %v176_v11  ;;  %v716_v16 = vpack.c.bf16 %v87_v15, %v86_v14  ;;  %v80_v17 = vld [vmem:[%s1073_s0] sm:$0xff]  ;;  %v178_v18 = vld [vmem:[#allocation7 + $0x20] sm:$0xff]  ;;  %v179_v19 = vld [vmem:[#allocation7 + $0x28] sm:$0xff]  ;;  %p887_p4 = scmp.ne.s32.totalorder %s520_s13, %s886_s14  ;;  %p892_p6 = scmp.lt.s32.totalorder %s886_s14, %s886_s14 }
  0x4e   :  { %709 = vmatprep.subr.bf16.mxu0 %v708_v7  ;;  %743 = vmatprep.subr.bf16.mxu1 %v922_v0  ;;  %v747_v20 = vpack.c.bf16 %v179_v19, %v178_v18  ;;  %v88_v21 = vld [vmem:[#allocation5 + $0x30] sm:$0xff]  ;;  %v89_v22 = vld [vmem:[#allocation5 + $0x38] sm:$0xff]  ;;  %v90_v27 = vld [vmem:[#allocation5 + $0x40] sm:$0xff] }
  0x4f   :  { %711 = vmatpush3.bf16.xpose.msra.mxu0 %v708_v7  ;;  %625 = vmatprep.mubr.f32.mxu0 %v80_v17  ;;  %v720_v23 = vpack.c.bf16 %v89_v22, %v88_v21  ;;  %v180_v24 = vld [vmem:[#allocation7 + $0x30] sm:$0xff]  ;;  %v181_v25 = vld [vmem:[#allocation7 + $0x38] sm:$0xff]  ;;  %v91_v28 = vld [vmem:[#allocation5 + $0x48] sm:$0xff]  ;;  %p893_p7 = por %p892_p6, %p891_p5 }
  0x50   :  { %713 = vmatprep.subr.bf16.mxu0 %v712_v10  ;;  %v750_v26 = vpack.c.bf16 %v181_v25, %v180_v24  ;;  %v724_v29 = vpack.c.bf16 %v91_v28, %v90_v27  ;;  %v182_v30 = vld [vmem:[#allocation7 + $0x40] sm:$0xff]  ;;  %v183_v31 = vld [vmem:[#allocation7 + $0x48] sm:$0xff]  ;;  %v92_v33 = vld [vmem:[#allocation5 + $0x50] sm:$0xff] }
  0x51   :  { %v753_v32 = vpack.c.bf16 %v183_v31, %v182_v30  ;;  %v93_v34 = vld [vmem:[#allocation5 + $0x58] sm:$0xff]  ;;  %v184_v36 = vld [vmem:[#allocation7 + $0x50] sm:$0xff]  ;;  %v94_v39 = vld [vmem:[#allocation5 + $0x60] sm:$0xff]  ;;  %p894_p8 = pnand %p893_p7, %p887_p4 }
  0x52   :  { %v728_v35 = vpack.c.bf16 %v93_v34, %v92_v33  ;;  %v185_v37 = vld [vmem:[#allocation7 + $0x58] sm:$0xff]  ;;  %v95_v40 = vld [vmem:[#allocation5 + $0x68] sm:$0xff]  ;;  %v186_v42 = vld [vmem:[#allocation7 + $0x60] sm:$0xff] }
  0x53   :  { %v756_v38 = vpack.c.bf16 %v185_v37, %v184_v36  ;;  %v732_v41 = vpack.c.bf16 %v95_v40, %v94_v39  ;;  %v187_v43 = vld [vmem:[#allocation7 + $0x68] sm:$0xff]  ;;  %v96_v45 = vld [vmem:[#allocation5 + $0x70] sm:$0xff]  ;;  %v97_v46 = vld [vmem:[#allocation5 + $0x78] sm:$0xff] }
  0x54   :  { %v759_v44 = vpack.c.bf16 %v187_v43, %v186_v42  ;;  %v736_v47 = vpack.c.bf16 %v97_v46, %v96_v45  ;;  %v188_v48 = vld [vmem:[#allocation7 + $0x70] sm:$0xff]  ;;  %v189_v49 = vld [vmem:[#allocation7 + $0x78] sm:$0xff]  ;;  %v261_v51 = vld [vmem:[#allocation8] sm:$0xff] }
  0x55   :  { %745 = vmatpush3.bf16.xpose.msra.mxu1 %v744_v13  ;;  %v762_v50 = vpack.c.bf16 %v189_v49, %v188_v48  ;;  %v262_v52 = vld [vmem:[#allocation8 + $0x8] sm:$0xff]  ;;  %v173_v53 = vld [vmem:[%s1074_s1] sm:$0xff]  ;;  %v81_v54 = vld [vmem:[%s1073_s0 + $0x8] sm:$0xff] }
  0x56   :  { %746 = vmatprep.subr.bf16.mxu1 %v922_v0  ;;  %v765_v55 = vpack.c.bf16 %v262_v52, %v261_v51  ;;  %v263_v56 = vld [vmem:[#allocation8 + $0x10] sm:$0xff]  ;;  %v264_v57 = vld [vmem:[#allocation8 + $0x18] sm:$0xff]  ;;  %v265_v59 = vld [vmem:[#allocation8 + $0x20] sm:$0xff] }
  0x57   :  { %715 = vmatpush3.bf16.xpose.msra.mxu0 %v712_v10  ;;  %v768_v58 = vpack.c.bf16 %v264_v57, %v263_v56  ;;  %v266_v60 = vld [vmem:[#allocation8 + $0x28] sm:$0xff]  ;;  %v267_v62 = vld [vmem:[#allocation8 + $0x30] sm:$0xff]  ;;  %v268_v63 = vld [vmem:[#allocation8 + $0x38] sm:$0xff] }
  0x58   :  { %717 = vmatprep.subr.bf16.mxu0 %v716_v16  ;;  %v771_v61 = vpack.c.bf16 %v266_v60, %v265_v59  ;;  %v774_v2 = vpack.c.bf16 %v268_v63, %v267_v62  ;;  %v270_v3 = vld [vmem:[#allocation8 + $0x48] sm:$0xff]  ;;  %v271_v5 = vld [vmem:[#allocation8 + $0x50] sm:$0xff]  ;;  %v272_v6 = vld [vmem:[#allocation8 + $0x58] sm:$0xff] }
  0x59   :  { %v780_v7 = vpack.c.bf16 %v272_v6, %v271_v5  ;;  %v273_v8 = vld [vmem:[#allocation8 + $0x60] sm:$0xff]  ;;  %v274_v9 = vld [vmem:[#allocation8 + $0x68] sm:$0xff]  ;;  %v275_v11 = vld [vmem:[#allocation8 + $0x70] sm:$0xff] }
  0x5a   :  { %v783_v10 = vpack.c.bf16 %v274_v9, %v273_v8  ;;  %v276_v12 = vld [vmem:[#allocation8 + $0x78] sm:$0xff]  ;;  %v423_v21 = vld [vmem:[%s1079_s6 + $0x8] sm:$0xff] }
  0x5b   :  { %v786_v13 = vpack.c.bf16 %v276_v12, %v275_v11  ;;  %v260_v14 = vld [vmem:[#allocation2] sm:$0xff]  ;;  %vm425_vm2 = vcmp.ge.u32.totalorder %v423_v21, 2147483648 }
  0x5d   :  { %748 = vmatpush3.bf16.xpose.msra.mxu1 %v747_v20 }
  0x5e   :  { %749 = vmatprep.subr.bf16.mxu1 %v922_v0 }
  0x5f   :  { %719 = vmatpush3.bf16.xpose.msra.mxu0 %v716_v16 }
  0x60   :  { %721 = vmatprep.subr.bf16.mxu0 %v720_v23 }
  0x65   :  { %751 = vmatpush3.bf16.xpose.msra.mxu1 %v750_v26 }
  0x66   :  { %752 = vmatprep.subr.bf16.mxu1 %v922_v0 }
  0x67   :  { %723 = vmatpush3.bf16.xpose.msra.mxu0 %v720_v23 }
  0x68   :  { %725 = vmatprep.subr.bf16.mxu0 %v724_v29 }
  0x6d   :  { %754 = vmatpush3.bf16.xpose.msra.mxu1 %v753_v32 }
  0x6e   :  { %755 = vmatprep.subr.bf16.mxu1 %v922_v0 }
  0x6f   :  { %727 = vmatpush3.bf16.xpose.msra.mxu0 %v724_v29 }
  0x70   :  { %729 = vmatprep.subr.bf16.mxu0 %v728_v35 }
  0x75   :  { %757 = vmatpush3.bf16.xpose.msra.mxu1 %v756_v38 }
  0x76   :  { %758 = vmatprep.subr.bf16.mxu1 %v922_v0 }
  0x77   :  { %731 = vmatpush3.bf16.xpose.msra.mxu0 %v728_v35 }
  0x78   :  { %733 = vmatprep.subr.bf16.mxu0 %v732_v41 }
  0x7d   :  { %760 = vmatpush3.bf16.xpose.msra.mxu1 %v759_v44 }
  0x7e   :  { %761 = vmatprep.subr.bf16.mxu1 %v922_v0 }
  0x7f   :  { %735 = vmatpush3.bf16.xpose.msra.mxu0 %v732_v41 }
  0x80   :  { %737 = vmatprep.subr.bf16.mxu0 %v736_v47 }
  0x85   :  { %763 = vmatpush3.bf16.xpose.msra.mxu1 %v762_v50 }
  0x87   :  { %739 = vmatpush3.bf16.xpose.msra.mxu0 %v736_v47 }
  0x88   :  { %764 = vmatprep.subr.bf16.mxu0 %v922_v0 }
  0x8c   :  { %661 = vmatmul.mubr.f32.vlgmr.msra.gmra.mrb[0].mxu1 %v173_v53 }
  0x8e   :  { %626 = vmatmul.mubr.f32.vlgmr.msra.gmra.mrb[0].mxu0 %v81_v54 }
  0x8f   :  { %766 = vmatpush3.bf16.xpose.msra.mxu0 %v765_v55  ;;  %695 = vmatprep.mubr.msk.f32.mxu0 %vm923_vm0, %v924_v1  ;;  %v269_v1 = vld [vmem:[#allocation8 + $0x40] sm:$0xff] }
  0x90   :  { %767 = vmatprep.subr.bf16.mxu0 %v922_v0  ;;  %v777_v4 = vpack.c.bf16 %v270_v3, %v269_v1 }
  0x97   :  { %769 = vmatpush3.bf16.xpose.msra.mxu0 %v768_v58 }
  0x98   :  { %770 = vmatprep.subr.bf16.mxu0 %v922_v0 }
  0x9f   :  { %772 = vmatpush3.bf16.xpose.msra.mxu0 %v771_v61 }
  0xa0   :  { %773 = vmatprep.subr.bf16.mxu0 %v922_v0 }
  0xa7   :  { %775 = vmatpush3.bf16.xpose.msra.mxu0 %v774_v2 }
  0xa8   :  { %776 = vmatprep.subr.bf16.mxu0 %v922_v0 }
  0xaf   :  { %778 = vmatpush3.bf16.xpose.msra.mxu0 %v777_v4 }
  0xb0   :  { %779 = vmatprep.subr.bf16.mxu0 %v922_v0 }
  0xb7   :  { %781 = vmatpush3.bf16.xpose.msra.mxu0 %v780_v7 }
  0xb8   :  { %782 = vmatprep.subr.bf16.mxu0 %v922_v0 }
  0xbf   :  { %784 = vmatpush3.bf16.xpose.msra.mxu0 %v783_v10 }
  0xc0   :  { %785 = vmatprep.subr.bf16.mxu0 %v922_v0  ;;  %v422_v0 = vld [vmem:[%s1079_s6] sm:$0xff] }
  0xc1   :  { %vm424_vm1 = vcmp.ge.u32.totalorder %v422_v0, 2147483648 }
  0xc7   :  { %787 = vmatpush3.bf16.xpose.msra.mxu0 %v786_v13 }
  0xce   :  { %696 = vmatmul.mubr.f32.vlgmr.msra.gmra.mrb[2].mxu0 %v260_v14 }
 0x15f   :  { %v256_v15 = vpop.f32.mrb[0].mxu1 }
 0x160   :  { %v662_v16 = vpop.f32.mrb[1].mxu1  ;;  %698 = vmatprep.subr.mxu1 %v256_v15 }
 0x161   :  { %v627_v17 = vpop.f32.mrb[0].mxu0  ;;  %699 = vmatpush3.xpose.msra.mxu1 %v256_v15 }
 0x162   :  { %v164_v18 = vpop.f32.mrb[1].mxu0 }
 0x163   :  { %700 = vmatprep.mubr.f32.mxu1 %v164_v18 }
 0x164   :  { %701 = vmatmul.mubr.f32.vlgmr.msra.gmra.mrb[2].mxu1 %v627_v17 }
 0x1a1   :  { %v343_v19 = vpop.f32.mrb[2].mxu0 }
 0x1a2   :  { %v697_v20 = vpop.f32.mrb[3].mxu0  ;;  %703 = vmatprep.subr.mxu1 %v343_v19 }
 0x1a3   :  { %704 = vmatpush3.msra.mxu1 %v343_v19 }
 0x237   :  { %v702_v22 = vpop.f32.mrb[2].mxu1 }
 0x238   :  { %v427_v23 = vmul.f32 0.70710677, %v702_v22  ;;  %v413_v24 = vpop.f32.mrb[3].mxu1 }
 0x239   :  { %v426_v25 = vmul.f32 0.70710677, %v413_v24 }
 0x23a   :  { %v429_v27 = vsel %vm425_vm2, %v427_v23, 0.0 }
 0x23b   :  { %v428_v26 = vsel %vm424_vm1, %v426_v25, 0.0 }
 0x23c   :  { %705 = vmatprep.mubr.msk.f32.mxu1 %vm430_vm3, %v428_v26 }
 0x23d   :  { %706 = vmatmul.mubr.msk.f32.vlgmr.msra.gmra.mrb[4].mxu1 %vm430_vm3, %v429_v27 }
 0x310   :  { %v707_v28 = vpop.f32.mrb[4].mxu1 }
 0x311   :  { %513 = vst [vmem:[#allocation10 + $0x8] sm:$0xff] %v707_v28  ;;  %v503_v29 = vpop.f32.mrb[5].mxu1 }
 0x312   :  { %512 = vst [vmem:[#allocation10] sm:$0xff] %v503_v29 }
 0x313   :  { %897 = shalt.err (!%p894_p8)
}
 0x314   :  { %s898_s15 = scalar_lea.hbm %s1080_s7, 256 }
 0x315   :  { %p899_p9 = scmp.ne.s32.totalorder %s1080_s7, %s898_s15  ;;  %p902_p10 = scmp.lt.u32.totalorder %s898_s15, %s1080_s7 }
 0x317   :  { %p904_p11 = pnand %p902_p10, %p899_p9 }
 0x319   :  { %907 = shalt.err (!%p904_p11)
}
 0x31a   :  { %525 = dma.vmem_to_hbm [thread:$0]  %s520_s13, 256, %s1080_s7, [#allocation4], %s917_s11, %s917_s11, %s918_s12  }
 0x31b   :  { %914 = dma.done.wait [#allocation4], 256  }
 0x31c   :  { %915 = vsyncadd [#allocation4], 4294967040 }
 0x31d   :  { %529 = vsyncpa [#allocation3], 1 }
 0x31e   :  { %530 = vsyncpa [#allocation6], 1 }
 0x31f   :  { %531 = vsyncpa [#allocation9], 1 }
 0x320   :  { %532 = vsyncpa [#allocation4], 1 }

</bundles_post_ra>
